<compile_context>
chip_gen: v5e
topology: v5e:2x2
jax: 0.10.0
libtpu: 0.0.40
codegen_flags: <defaults>
</compile_context>

<pallas_src>
import jax
import jax.numpy as jnp
from jax.experimental import pallas as pl
from jax.experimental.pallas import tpu as pltpu

DIM_U = 7  # = len(np.arange(4)) + len(np.arange(4, 7))
LAYER_SIZES = [DIM_U, 16, 32, 64, 128, 128, 64, 16, DIM_U]
NUM_LAYERS = len(LAYER_SIZES) - 1  # 8 Linear layers
PAD = 128                          # lane width all layers are padded to
TILE_B_DEFAULT = 512               # batch-tile rows (multiple of MXU M dim)


def _round_up(n, m):
    return ((n + m - 1) // m) * m


def dynet_kernel(x_ref, w_ref, b_ref, o_ref):
    """x_ref: (TILE_B, 128) f32, w_ref: (8, 128, 128) bf16, b_ref: (8, 128) f32."""
    h = x_ref[...].astype(jnp.float32)
    for i in range(NUM_LAYERS):
        w = w_ref[i]                 # (128, 128) bf16, resident in VMEM
        b = b_ref[i:i + 1, :]        # (1, 128) f32
        h = jnp.dot(h.astype(jnp.bfloat16), w,
                    preferred_element_type=jnp.float32) + b
        if i < NUM_LAYERS - 1:       # ReLU on all but the last layer
            h = jnp.maximum(h, 0.0)
    o_ref[...] = h.astype(o_ref.dtype)   # lane-dense 128-wide unmasked store


def init_params(key):
    """Deterministic PyTorch-style (uniform +/- 1/sqrt(fan_in)) initialization."""
    params = []
    for i in range(NUM_LAYERS):
        fan_in, fan_out = LAYER_SIZES[i], LAYER_SIZES[i + 1]
        key, kw, kb = jax.random.split(key, 3)
        bound = 1.0 / (fan_in ** 0.5)
        w = jax.random.uniform(kw, (fan_in, fan_out), jnp.float32, -bound, bound)
        b = jax.random.uniform(kb, (fan_out,), jnp.float32, -bound, bound)
        params.append((w, b))
    return params


def pack_params(params):
    """One-time host-side packing: pad every layer to 128x128 and stack.

    Weights -> (8, 128, 128) bf16, biases -> (8, 128) f32.  Padding is zeros
    only, so padded columns stay exactly zero through the whole network.
    """
    w_stack = jnp.zeros((NUM_LAYERS, PAD, PAD), jnp.float32)
    b_stack = jnp.zeros((NUM_LAYERS, PAD), jnp.float32)
    for i, (w, b) in enumerate(params):
        w_stack = w_stack.at[i, : w.shape[0], : w.shape[1]].set(w)
        b_stack = b_stack.at[i, : b.shape[0]].set(b)
    return w_stack.astype(jnp.bfloat16), b_stack


def dynet_forward(t, x, packed_params, *, tile_b=None):
    """Mirrors DyNet.forward(t, x): `t` is ignored.  x: (batch, 7) f32."""
    del t
    w_stack, b_stack = packed_params
    batch = x.shape[0]

    if tile_b is None:
        tile_b = min(TILE_B_DEFAULT, _round_up(batch, 8))
    padded_batch = _round_up(batch, tile_b)

    # Zero-pad input to lane width 128 and batch to a tile multiple.
    x_pad = jnp.zeros((padded_batch, PAD), x.dtype).at[:batch, :DIM_U].set(x)

    grid = (pl.cdiv(padded_batch, tile_b),)
    out = pl.pallas_call(
        dynet_kernel,
        out_shape=jax.ShapeDtypeStruct((padded_batch, PAD), x.dtype),
        grid=grid,
        in_specs=[
            # x: tiled along batch.
            pl.BlockSpec((tile_b, PAD), lambda i: (i, 0)),
            # weights/biases: full arrays, constant block index -> VMEM-resident
            # across all batch tiles (Pallas skips the repeat DMA).
            pl.BlockSpec((NUM_LAYERS, PAD, PAD), lambda i: (0, 0, 0)),
            pl.BlockSpec((NUM_LAYERS, PAD), lambda i: (0, 0)),
        ],
        out_specs=pl.BlockSpec((tile_b, PAD), lambda i: (i, 0)),
        compiler_params=pltpu.CompilerParams(
            dimension_semantics=("parallel",),  # megacore-shard batch tiles
        ),
    )(x_pad, w_stack, b_stack)

    return out[:batch, :DIM_U]


def dynet_forward_ref_bf16(t, x, params):
    """Pure-JAX reference matching the kernel's bf16-matmul / f32-accumulate math."""
    del t
    h = x
    for i, (w, b) in enumerate(params):
        h = jnp.dot(h.astype(jnp.bfloat16), w.astype(jnp.bfloat16),
                    preferred_element_type=jnp.float32) + b
        if i < NUM_LAYERS - 1:
            h = jnp.maximum(h, 0.0)
    return h


def dynet_forward_ref_f32(t, x, params):
    """Full-precision pure-JAX reference (loose sanity check only)."""
    del t
    h = x
    for i, (w, b) in enumerate(params):
        h = h @ w + b
        if i < NUM_LAYERS - 1:
            h = jnp.maximum(h, 0.0)
    return h


if __name__ == "__main__":
    key = jax.random.PRNGKey(0)
    key, kx, kx2 = jax.random.split(key, 3)

    params = init_params(jax.random.PRNGKey(0))
    packed = pack_params(params)
    t = jnp.float32(0.0)  # ignored by the forward pass, kept for signature parity

    # --- small batch (single tile) ---
    batch = 8
    x = jax.random.normal(kx, (batch, DIM_U), dtype=jnp.float32)
    out = jax.block_until_ready(dynet_forward(t, x, packed))
    assert out.shape == (batch, DIM_U)

    ref_bf16 = dynet_forward_ref_bf16(t, x, params)
    assert jnp.allclose(out, ref_bf16, atol=1e-4, rtol=1e-4), \
        "mismatch vs bf16-matched JAX reference"
    ref_f32 = dynet_forward_ref_f32(t, x, params)
    assert jnp.allclose(out, ref_f32, atol=1e-1, rtol=1e-1), \
        "mismatch vs f32 JAX reference (beyond bf16 tolerance)"

    # --- larger batch, multi-tile grid path (4 batch tiles of 128 rows) ---
    batch2 = 512
    x2 = jax.random.normal(kx2, (batch2, DIM_U), dtype=jnp.float32)
    out2 = jax.block_until_ready(dynet_forward(t, x2, packed, tile_b=128))
    assert out2.shape == (batch2, DIM_U)
    ref2 = dynet_forward_ref_bf16(t, x2, params)
    assert jnp.allclose(out2, ref2, atol=1e-4, rtol=1e-4), \
        "mismatch vs bf16-matched JAX reference (tiled path)"

    print("KERNEL_OK")
</pallas_src>

<mosaic_0001>
module attributes {stable_mosaic.version = 11 : i64} {
  func.func @dynet_kernel(%arg0: i32, %arg1: memref<8x128xf32, #tpu.memory_space<vmem>>, %arg2: memref<8x128x128xbf16, #tpu.memory_space<vmem>>, %arg3: memref<8x128xf32, #tpu.memory_space<vmem>>, %arg4: memref<8x128xf32, #tpu.memory_space<vmem>>) attributes {dimension_semantics = [#tpu.dimension_semantics<parallel>], iteration_bounds = array<i64: 1>, scalar_prefetch = 0 : i64, scratch_operands = 0 : i64, tpu.core_type = #tpu.core_type<tc>, window_params = [{transform_indices = @transform_0, window_bounds = array<i64: 8, 128>}, {pipeline_mode = #tpu.pipeline_mode<synchronous>, transform_indices = @transform_1, window_bounds = array<i64: 8, 128, 128>}, {pipeline_mode = #tpu.pipeline_mode<synchronous>, transform_indices = @transform_2, window_bounds = array<i64: 8, 128>}, {transform_indices = @transform_3, window_bounds = array<i64: 8, 128>}]} {
    %c0 = arith.constant 0 : index
    %c0_0 = arith.constant 0 : index
    %0 = vector.load %arg1[%c0, %c0_0] : memref<8x128xf32, #tpu.memory_space<vmem>>, vector<8x128xf32>
    %c0_1 = arith.constant 0 : index
    %c0_2 = arith.constant 0 : index
    %c0_3 = arith.constant 0 : index
    %1 = vector.load %arg2[%c0_1, %c0_2, %c0_3] : memref<8x128x128xbf16, #tpu.memory_space<vmem>>, vector<1x128x128xbf16>
    %2 = vector.shape_cast %1 : vector<1x128x128xbf16> to vector<128x128xbf16>
    %c0_4 = arith.constant 0 : index
    %c0_5 = arith.constant 0 : index
    %3 = vector.load %arg3[%c0_4, %c0_5] : memref<8x128xf32, #tpu.memory_space<vmem>>, vector<1x128xf32>
    %4 = arith.truncf %0 : vector<8x128xf32> to vector<8x128xbf16>
    %cst = arith.constant dense<0.000000e+00> : vector<8x128xf32>
    %5 = tpu.matmul %4, %2, %cst {dimension_numbers = #tpu.dot_dimension_numbers<[1], [0], [0], [1], [0, 0, 1, 1], [], []>} : vector<8x128xbf16>, vector<128x128xbf16>, vector<8x128xf32> -> vector<8x128xf32>
    %6 = vector.broadcast %3 : vector<1x128xf32> to vector<8x128xf32>
    %7 = arith.addf %5, %6 : vector<8x128xf32>
    %cst_6 = arith.constant 0.000000e+00 : f32
    %8 = vector.broadcast %cst_6 : f32 to vector<8x128xf32>
    %9 = arith.maximumf %7, %8 : vector<8x128xf32>
    %c1 = arith.constant 1 : index
    %c0_7 = arith.constant 0 : index
    %c0_8 = arith.constant 0 : index
    %10 = vector.load %arg2[%c1, %c0_7, %c0_8] : memref<8x128x128xbf16, #tpu.memory_space<vmem>>, vector<1x128x128xbf16>
    %11 = vector.shape_cast %10 : vector<1x128x128xbf16> to vector<128x128xbf16>
    %c1_9 = arith.constant 1 : index
    %c0_10 = arith.constant 0 : index
    %12 = vector.load %arg3[%c1_9, %c0_10] : memref<8x128xf32, #tpu.memory_space<vmem>>, vector<1x128xf32>
    %13 = arith.truncf %9 : vector<8x128xf32> to vector<8x128xbf16>
    %cst_11 = arith.constant dense<0.000000e+00> : vector<8x128xf32>
    %14 = tpu.matmul %13, %11, %cst_11 {dimension_numbers = #tpu.dot_dimension_numbers<[1], [0], [0], [1], [0, 0, 1, 1], [], []>} : vector<8x128xbf16>, vector<128x128xbf16>, vector<8x128xf32> -> vector<8x128xf32>
    %15 = vector.broadcast %12 : vector<1x128xf32> to vector<8x128xf32>
    %16 = arith.addf %14, %15 : vector<8x128xf32>
    %cst_12 = arith.constant 0.000000e+00 : f32
    %17 = vector.broadcast %cst_12 : f32 to vector<8x128xf32>
    %18 = arith.maximumf %16, %17 : vector<8x128xf32>
    %c2 = arith.constant 2 : index
    %c0_13 = arith.constant 0 : index
    %c0_14 = arith.constant 0 : index
    %19 = vector.load %arg2[%c2, %c0_13, %c0_14] : memref<8x128x128xbf16, #tpu.memory_space<vmem>>, vector<1x128x128xbf16>
    %20 = vector.shape_cast %19 : vector<1x128x128xbf16> to vector<128x128xbf16>
    %c2_15 = arith.constant 2 : index
    %c0_16 = arith.constant 0 : index
    %21 = vector.load %arg3[%c2_15, %c0_16] : memref<8x128xf32, #tpu.memory_space<vmem>>, vector<1x128xf32>
    %22 = arith.truncf %18 : vector<8x128xf32> to vector<8x128xbf16>
    %cst_17 = arith.constant dense<0.000000e+00> : vector<8x128xf32>
    %23 = tpu.matmul %22, %20, %cst_17 {dimension_numbers = #tpu.dot_dimension_numbers<[1], [0], [0], [1], [0, 0, 1, 1], [], []>} : vector<8x128xbf16>, vector<128x128xbf16>, vector<8x128xf32> -> vector<8x128xf32>
    %24 = vector.broadcast %21 : vector<1x128xf32> to vector<8x128xf32>
    %25 = arith.addf %23, %24 : vector<8x128xf32>
    %cst_18 = arith.constant 0.000000e+00 : f32
    %26 = vector.broadcast %cst_18 : f32 to vector<8x128xf32>
    %27 = arith.maximumf %25, %26 : vector<8x128xf32>
    %c3 = arith.constant 3 : index
    %c0_19 = arith.constant 0 : index
    %c0_20 = arith.constant 0 : index
    %28 = vector.load %arg2[%c3, %c0_19, %c0_20] : memref<8x128x128xbf16, #tpu.memory_space<vmem>>, vector<1x128x128xbf16>
    %29 = vector.shape_cast %28 : vector<1x128x128xbf16> to vector<128x128xbf16>
    %c3_21 = arith.constant 3 : index
    %c0_22 = arith.constant 0 : index
    %30 = vector.load %arg3[%c3_21, %c0_22] : memref<8x128xf32, #tpu.memory_space<vmem>>, vector<1x128xf32>
    %31 = arith.truncf %27 : vector<8x128xf32> to vector<8x128xbf16>
    %cst_23 = arith.constant dense<0.000000e+00> : vector<8x128xf32>
    %32 = tpu.matmul %31, %29, %cst_23 {dimension_numbers = #tpu.dot_dimension_numbers<[1], [0], [0], [1], [0, 0, 1, 1], [], []>} : vector<8x128xbf16>, vector<128x128xbf16>, vector<8x128xf32> -> vector<8x128xf32>
    %33 = vector.broadcast %30 : vector<1x128xf32> to vector<8x128xf32>
    %34 = arith.addf %32, %33 : vector<8x128xf32>
    %cst_24 = arith.constant 0.000000e+00 : f32
    %35 = vector.broadcast %cst_24 : f32 to vector<8x128xf32>
    %36 = arith.maximumf %34, %35 : vector<8x128xf32>
    %c4 = arith.constant 4 : index
    %c0_25 = arith.constant 0 : index
    %c0_26 = arith.constant 0 : index
    %37 = vector.load %arg2[%c4, %c0_25, %c0_26] : memref<8x128x128xbf16, #tpu.memory_space<vmem>>, vector<1x128x128xbf16>
    %38 = vector.shape_cast %37 : vector<1x128x128xbf16> to vector<128x128xbf16>
    %c4_27 = arith.constant 4 : index
    %c0_28 = arith.constant 0 : index
    %39 = vector.load %arg3[%c4_27, %c0_28] : memref<8x128xf32, #tpu.memory_space<vmem>>, vector<1x128xf32>
    %40 = arith.truncf %36 : vector<8x128xf32> to vector<8x128xbf16>
    %cst_29 = arith.constant dense<0.000000e+00> : vector<8x128xf32>
    %41 = tpu.matmul %40, %38, %cst_29 {dimension_numbers = #tpu.dot_dimension_numbers<[1], [0], [0], [1], [0, 0, 1, 1], [], []>} : vector<8x128xbf16>, vector<128x128xbf16>, vector<8x128xf32> -> vector<8x128xf32>
    %42 = vector.broadcast %39 : vector<1x128xf32> to vector<8x128xf32>
    %43 = arith.addf %41, %42 : vector<8x128xf32>
    %cst_30 = arith.constant 0.000000e+00 : f32
    %44 = vector.broadcast %cst_30 : f32 to vector<8x128xf32>
    %45 = arith.maximumf %43, %44 : vector<8x128xf32>
    %c5 = arith.constant 5 : index
    %c0_31 = arith.constant 0 : index
    %c0_32 = arith.constant 0 : index
    %46 = vector.load %arg2[%c5, %c0_31, %c0_32] : memref<8x128x128xbf16, #tpu.memory_space<vmem>>, vector<1x128x128xbf16>
    %47 = vector.shape_cast %46 : vector<1x128x128xbf16> to vector<128x128xbf16>
    %c5_33 = arith.constant 5 : index
    %c0_34 = arith.constant 0 : index
    %48 = vector.load %arg3[%c5_33, %c0_34] : memref<8x128xf32, #tpu.memory_space<vmem>>, vector<1x128xf32>
    %49 = arith.truncf %45 : vector<8x128xf32> to vector<8x128xbf16>
    %cst_35 = arith.constant dense<0.000000e+00> : vector<8x128xf32>
    %50 = tpu.matmul %49, %47, %cst_35 {dimension_numbers = #tpu.dot_dimension_numbers<[1], [0], [0], [1], [0, 0, 1, 1], [], []>} : vector<8x128xbf16>, vector<128x128xbf16>, vector<8x128xf32> -> vector<8x128xf32>
    %51 = vector.broadcast %48 : vector<1x128xf32> to vector<8x128xf32>
    %52 = arith.addf %50, %51 : vector<8x128xf32>
    %cst_36 = arith.constant 0.000000e+00 : f32
    %53 = vector.broadcast %cst_36 : f32 to vector<8x128xf32>
    %54 = arith.maximumf %52, %53 : vector<8x128xf32>
    %c6 = arith.constant 6 : index
    %c0_37 = arith.constant 0 : index
    %c0_38 = arith.constant 0 : index
    %55 = vector.load %arg2[%c6, %c0_37, %c0_38] : memref<8x128x128xbf16, #tpu.memory_space<vmem>>, vector<1x128x128xbf16>
    %56 = vector.shape_cast %55 : vector<1x128x128xbf16> to vector<128x128xbf16>
    %c6_39 = arith.constant 6 : index
    %c0_40 = arith.constant 0 : index
    %57 = vector.load %arg3[%c6_39, %c0_40] : memref<8x128xf32, #tpu.memory_space<vmem>>, vector<1x128xf32>
    %58 = arith.truncf %54 : vector<8x128xf32> to vector<8x128xbf16>
    %cst_41 = arith.constant dense<0.000000e+00> : vector<8x128xf32>
    %59 = tpu.matmul %58, %56, %cst_41 {dimension_numbers = #tpu.dot_dimension_numbers<[1], [0], [0], [1], [0, 0, 1, 1], [], []>} : vector<8x128xbf16>, vector<128x128xbf16>, vector<8x128xf32> -> vector<8x128xf32>
    %60 = vector.broadcast %57 : vector<1x128xf32> to vector<8x128xf32>
    %61 = arith.addf %59, %60 : vector<8x128xf32>
    %cst_42 = arith.constant 0.000000e+00 : f32
    %62 = vector.broadcast %cst_42 : f32 to vector<8x128xf32>
    %63 = arith.maximumf %61, %62 : vector<8x128xf32>
    %c7 = arith.constant 7 : index
    %c0_43 = arith.constant 0 : index
    %c0_44 = arith.constant 0 : index
    %64 = vector.load %arg2[%c7, %c0_43, %c0_44] : memref<8x128x128xbf16, #tpu.memory_space<vmem>>, vector<1x128x128xbf16>
    %65 = vector.shape_cast %64 : vector<1x128x128xbf16> to vector<128x128xbf16>
    %c7_45 = arith.constant 7 : index
    %c0_46 = arith.constant 0 : index
    %66 = vector.load %arg3[%c7_45, %c0_46] : memref<8x128xf32, #tpu.memory_space<vmem>>, vector<1x128xf32>
    %67 = arith.truncf %63 : vector<8x128xf32> to vector<8x128xbf16>
    %cst_47 = arith.constant dense<0.000000e+00> : vector<8x128xf32>
    %68 = tpu.matmul %67, %65, %cst_47 {dimension_numbers = #tpu.dot_dimension_numbers<[1], [0], [0], [1], [0, 0, 1, 1], [], []>} : vector<8x128xbf16>, vector<128x128xbf16>, vector<8x128xf32> -> vector<8x128xf32>
    %69 = vector.broadcast %66 : vector<1x128xf32> to vector<8x128xf32>
    %70 = arith.addf %68, %69 : vector<8x128xf32>
    %c0_48 = arith.constant 0 : index
    %c0_49 = arith.constant 0 : index
    %71 = vector.load %arg4[%c0_48, %c0_49] : memref<8x128xf32, #tpu.memory_space<vmem>>, vector<8x128xf32>
    tpu.vector_store %arg4[%c0_48, %c0_49], %70 {strides = array<i32>} : memref<8x128xf32, #tpu.memory_space<vmem>>, vector<8x128xf32>,
    return
  }
  func.func @transform_0(%arg0: i32) -> (i32, i32) {
    %c0_i32 = arith.constant 0 : i32
    %c0_i32_0 = arith.constant 0 : i32
    return %arg0, %c0_i32 : i32, i32
  }
  func.func @transform_1(%arg0: i32) -> (i32, i32, i32) {
    %c0_i32 = arith.constant 0 : i32
    %c0_i32_0 = arith.constant 0 : i32
    %c0_i32_1 = arith.constant 0 : i32
    %c0_i32_2 = arith.constant 0 : i32
    return %c0_i32, %c0_i32_0, %c0_i32_1 : i32, i32, i32
  }
  func.func @transform_2(%arg0: i32) -> (i32, i32) {
    %c0_i32 = arith.constant 0 : i32
    %c0_i32_0 = arith.constant 0 : i32
    %c0_i32_1 = arith.constant 0 : i32
    return %c0_i32, %c0_i32_0 : i32, i32
  }
  func.func @transform_3(%arg0: i32) -> (i32, i32) {
    %c0_i32 = arith.constant 0 : i32
    %c0_i32_0 = arith.constant 0 : i32
    return %arg0, %c0_i32 : i32, i32
  }
}

</mosaic_0001>

<bundles_post_ra>
// kernel: tpu_custom_call.1
= control target key start
LH: loop header
LB: loop body
LE: loop exit
PB: predicated region body
PF: predicated region fallthrough
CT: control target
= control target key end

     0   :  { %8 = vsyncpa [#allocation3], 0  ;;  %s1206_s0 = inlined_call_operand.hbm [shape: f32[8,128], index: 0, kind: input, shape index: {}]   ;;  %s1207_s1 = inlined_call_operand.hbm [shape: bf16[8,128,128], index: 1, kind: input, shape index: {}]   ;;  %s1208_s2 = inlined_call_operand.hbm [shape: f32[8,128], index: 2, kind: input, shape index: {}]   ;;  %s1209_s3 = inlined_call_operand.hbm [shape: f32[8,128], index: 3, kind: output, shape index: {}]  }
   0x1   :  { %9 = vsyncpa [#allocation6], 0  ;;  %s26_s14 = sshll.u32 %s1207_s1, 4  ;;  %s27_s14 = int_to_ptr.hbm [resolvable:$true] %s26_s14 }
   0x2   :  { %10 = vsyncpa [#allocation4], 0  ;;  %s1168_s15 = smov [#allocation5]   ;;  %s16_s19 = sshll.u32 %s1206_s0, 4  ;;  %s17_s19 = int_to_ptr.hbm [resolvable:$true] %s16_s19 }
   0x3   :  { %s28_s16 = sshll.u32 %s1168_s15, 4  ;;  %s1169_s20 = smov 64   ;;  %s29_s16 = int_to_ptr.vmem [resolvable:$true] %s28_s16 }
   0x4   :  { %s1170_s21 = smov 4   ;;  %s1171_s22 = smov [#allocation2]  }
   0x5   :  { %34 = dma.hbm_to_vmem [thread:$0]  %s27_s14, 8192, %s29_s16, [#allocation6], %s1169_s20, %s1169_s20, %s1170_s21  }
   0x6   :  { %s18_s23 = sshll.u32 %s1171_s22, 4  ;;  %s40_s26 = sshll.u32 %s1208_s2, 4  ;;  %s19_s23 = int_to_ptr.vmem [resolvable:$true] %s18_s23  ;;  %s41_s26 = int_to_ptr.hbm [resolvable:$true] %s40_s26 }
   0x7   :  { %21 = dma.hbm_to_vmem [thread:$0]  %s17_s19, 128, %s19_s23, [#allocation3]  }
   0x8   :  { %s1172_s1 = smov [#allocation7]  }
   0x9   :  { %s42_s27 = sshll.u32 %s1172_s1, 4  ;;  %s43_s27 = int_to_ptr.vmem [resolvable:$true] %s42_s27 }
   0xa   :  { %45 = dma.hbm_to_vmem [thread:$0]  %s41_s26, 128, %s43_s27, [#allocation6]  }
   0xb   :  { %1162 = dma.done.wait [#allocation3], 128  }
   0xc   :  { %1163 = vsyncadd [#allocation3], 4294967168 }
   0xd   :  { %1164 = dma.done.wait [#allocation6], 8320  }
   0xe   :  { %1165 = vsyncadd [#allocation6], 4294958976  ;;  %v995_v0 = vld [vmem:[#allocation5 + $0x38] sm:$0xff]  ;;  %v994_v1 = vld [vmem:[#allocation5 + $0x30] sm:$0xff]  ;;  %s1173_s0 = smov [#allocation8]   ;;  %s721_s30 = sshll.u32 %s1209_s3, 4  ;;  %s722_s30 = int_to_ptr.hbm [resolvable:$true] %s721_s30 }
   0xf   :  { %126 = vmatpush.bf16.msra.mxu0 %v995_v0  ;;  %v1003_v2 = vld [vmem:[#allocation5 + $0x78] sm:$0xff]  ;;  %v993_v3 = vld [vmem:[#allocation5 + $0x28] sm:$0xff]  ;;  %v1002_v4 = vld [vmem:[#allocation5 + $0x70] sm:$0xff]  ;;  %s719_s2 = sshll.u32 %s1173_s0, 4  ;;  %s720_s2 = int_to_ptr.vmem [resolvable:$true] %s719_s2 }
  0x10   :  { %208 = vmatpush.bf16.msra.mxu1 %v1003_v2  ;;  %v1001_v5 = vld [vmem:[#allocation5 + $0x68] sm:$0xff]  ;;  %v992_v6 = vld [vmem:[#allocation5 + $0x20] sm:$0xff]  ;;  %v991_v8 = vld [vmem:[#allocation5 + $0x18] sm:$0xff] }
  0x11   :  { %v1000_v7 = vld [vmem:[#allocation5 + $0x60] sm:$0xff]  ;;  %v999_v9 = vld [vmem:[#allocation5 + $0x58] sm:$0xff]  ;;  %v990_v10 = vld [vmem:[#allocation5 + $0x10] sm:$0xff] }
  0x12   :  { %v998_v11 = vld [vmem:[#allocation5 + $0x50] sm:$0xff]  ;;  %v989_v12 = vld [vmem:[#allocation5 + $0x8] sm:$0xff]  ;;  %v988_v13 = vld [vmem:[#allocation5] sm:$0xff] }
  0x13   :  { %127 = vmatpush.bf16.msra.mxu0 %v994_v1  ;;  %v58_v14 = vld [vmem:[#allocation2] sm:$0xff]  ;;  %v997_v16 = vld [vmem:[#allocation5 + $0x48] sm:$0xff]  ;;  %v996_v17 = vld [vmem:[#allocation5 + $0x40] sm:$0xff] }
  0x14   :  { %209 = vmatpush.bf16.msra.mxu1 %v1002_v4  ;;  %v76_v15 = vpack.c.bf16 %v58_v14, %v58_v14  ;;  %v1011_v18 = vld [vmem:[#allocation5 + $0xb8] sm:$0xff]  ;;  %v1010_v19 = vld [vmem:[#allocation5 + $0xb0] sm:$0xff]  ;;  %v1009_v20 = vld [vmem:[#allocation5 + $0xa8] sm:$0xff] }
  0x15   :  { %290 = vmatpush.bf16.msra.mxu2 %v1011_v18  ;;  %v1008_v21 = vld [vmem:[#allocation5 + $0xa0] sm:$0xff]  ;;  %v1007_v22 = vld [vmem:[#allocation5 + $0x98] sm:$0xff]  ;;  %v1006_v23 = vld [vmem:[#allocation5 + $0x90] sm:$0xff] }
  0x16   :  { %v1058_v24 = vld [vmem:[#allocation7] ss:$0 sm:$0xff]  ;;  %v1005_v30 = vld [vmem:[#allocation5 + $0x88] sm:$0xff]  ;;  %v1019_v32 = vld [vmem:[#allocation5 + $0xf8] sm:$0xff] }
  0x17   :  { %128 = vmatpush.bf16.msra.mxu0 %v993_v3  ;;  %v1004_v31 = vld [vmem:[#allocation5 + $0x80] sm:$0xff]  ;;  %372 = vmatpush.bf16.msra.mxu3 %v1019_v32  ;;  %v1018_v33 = vld [vmem:[#allocation5 + $0xf0] sm:$0xff]  ;;  %v1017_v34 = vld [vmem:[#allocation5 + $0xe8] sm:$0xff] }
  0x18   :  { %210 = vmatpush.bf16.msra.mxu1 %v1001_v5  ;;  %v1016_v35 = vld [vmem:[#allocation5 + $0xe0] sm:$0xff]  ;;  %v1015_v36 = vld [vmem:[#allocation5 + $0xd8] sm:$0xff]  ;;  %v1014_v37 = vld [vmem:[#allocation5 + $0xd0] sm:$0xff] }
  0x19   :  { %291 = vmatpush.bf16.msra.mxu2 %v1010_v19  ;;  %v1059_v38 = vld [vmem:[#allocation7 + $0x1] ss:$0 sm:$0xff]  ;;  %v1013_v44 = vld [vmem:[#allocation5 + $0xc8] sm:$0xff]  ;;  %v1027_v46 = vld [vmem:[#allocation5 + $0x138] sm:$0xff] }
  0x1a   :  { %v1012_v45 = vld [vmem:[#allocation5 + $0xc0] sm:$0xff]  ;;  %v1026_v47 = vld [vmem:[#allocation5 + $0x130] sm:$0xff]  ;;  %v1025_v48 = vld [vmem:[#allocation5 + $0x128] sm:$0xff] }
  0x1b   :  { %129 = vmatpush.bf16.msra.mxu0 %v992_v6  ;;  %373 = vmatpush.bf16.msra.mxu3 %v1018_v33  ;;  %v1024_v49 = vld [vmem:[#allocation5 + $0x120] sm:$0xff]  ;;  %v1023_v50 = vld [vmem:[#allocation5 + $0x118] sm:$0xff]  ;;  %v1022_v51 = vld [vmem:[#allocation5 + $0x110] sm:$0xff] }
  0x1c   :  { %211 = vmatpush.bf16.msra.mxu1 %v1000_v7  ;;  %v1060_v52 = vld [vmem:[#allocation7 + $0x2] ss:$0 sm:$0xff]  ;;  %v1021_v58 = vld [vmem:[#allocation5 + $0x108] sm:$0xff]  ;;  %v1035_v60 = vld [vmem:[#allocation5 + $0x178] sm:$0xff] }
  0x1d   :  { %292 = vmatpush.bf16.msra.mxu2 %v1009_v20  ;;  %v1020_v59 = vld [vmem:[#allocation5 + $0x100] sm:$0xff]  ;;  %v1034_v61 = vld [vmem:[#allocation5 + $0x170] sm:$0xff]  ;;  %v1033_v62 = vld [vmem:[#allocation5 + $0x168] sm:$0xff] }
  0x1e   :  { %v1032_v63 = vld [vmem:[#allocation5 + $0x160] sm:$0xff]  ;;  %v1031_v0 = vld [vmem:[#allocation5 + $0x158] sm:$0xff]  ;;  %v1030_v1 = vld [vmem:[#allocation5 + $0x150] sm:$0xff] }
  0x1f   :  { %130 = vmatpush.bf16.msra.mxu0 %v991_v8  ;;  %374 = vmatpush.bf16.msra.mxu3 %v1017_v34  ;;  %v1061_v2 = vld [vmem:[#allocation7 + $0x3] ss:$0 sm:$0xff]  ;;  %v1029_v8 = vld [vmem:[#allocation5 + $0x148] sm:$0xff]  ;;  %v1039_v14 = vld [vmem:[#allocation5 + $0x198] sm:$0xff] }
  0x20   :  { %212 = vmatpush.bf16.msra.mxu1 %v999_v9  ;;  %v1028_v9 = vld [vmem:[#allocation5 + $0x140] sm:$0xff] }
  0x21   :  { %293 = vmatpush.bf16.msra.mxu2 %v1008_v21 }
  0x23   :  { %131 = vmatpush.bf16.msra.mxu0 %v990_v10  ;;  %375 = vmatpush.bf16.msra.mxu3 %v1016_v35  ;;  %v1043_v10 = vld [vmem:[#allocation5 + $0x1b8] sm:$0xff] }
  0x24   :  { %213 = vmatpush.bf16.msra.mxu1 %v998_v11  ;;  %v1042_v11 = vld [vmem:[#allocation5 + $0x1b0] sm:$0xff] }
  0x25   :  { %294 = vmatpush.bf16.msra.mxu2 %v1007_v22  ;;  %v1037_v22 = vld [vmem:[#allocation5 + $0x188] sm:$0xff] }
  0x27   :  { %132 = vmatpush.bf16.msra.mxu0 %v989_v12  ;;  %376 = vmatpush.bf16.msra.mxu3 %v1015_v36  ;;  %v1041_v12 = vld [vmem:[#allocation5 + $0x1a8] sm:$0xff] }
  0x28   :  { %214 = vmatpush.bf16.msra.mxu1 %v997_v16  ;;  %v1062_v16 = vld [vmem:[#allocation7 + $0x4] ss:$0 sm:$0xff]  ;;  %v1045_v36 = vld [vmem:[#allocation5 + $0x1c8] sm:$0xff] }
  0x29   :  { %295 = vmatpush.bf16.msra.mxu2 %v1006_v23  ;;  %v1036_v23 = vld [vmem:[#allocation5 + $0x180] sm:$0xff] }
  0x2b   :  { %133 = vmatpush.bf16.msra.mxu0 %v988_v13  ;;  %377 = vmatpush.bf16.msra.mxu3 %v1014_v37  ;;  %v1040_v13 = vld [vmem:[#allocation5 + $0x1a0] sm:$0xff] }
  0x2c   :  { %215 = vmatpush.bf16.msra.mxu1 %v996_v17  ;;  %v1044_v37 = vld [vmem:[#allocation5 + $0x1c0] sm:$0xff] }
  0x2d   :  { %296 = vmatpush.bf16.msra.mxu2 %v1005_v30  ;;  %v1063_v30 = vld [vmem:[#allocation7 + $0x5] ss:$0 sm:$0xff] }
  0x2e   :  { %134 = vmatmul.bf16.vlgmr.msra.gmra.mxu0 %v76_v15  ;;  %v1038_v15 = vld [vmem:[#allocation5 + $0x190] sm:$0xff] }
  0x2f   :  { %378 = vmatpush.bf16.msra.mxu3 %v1013_v44  ;;  %454 = vmatpush.bf16.msrb.mxu0 %v1027_v46  ;;  %v1065_v44 = vld [vmem:[#allocation7 + $0x7] ss:$0 sm:$0xff] }
  0x30   :  { %536 = vmatpush.bf16.msrb.mxu1 %v1035_v60 }
  0x31   :  { %297 = vmatpush.bf16.msra.mxu2 %v1004_v31 }
  0x33   :  { %379 = vmatpush.bf16.msra.mxu3 %v1012_v45  ;;  %455 = vmatpush.bf16.msrb.mxu0 %v1026_v47 }
  0x34   :  { %537 = vmatpush.bf16.msrb.mxu1 %v1034_v61 }
  0x35   :  { %618 = vmatpush.bf16.msrb.mxu2 %v1043_v10 }
  0x37   :  { %456 = vmatpush.bf16.msrb.mxu0 %v1025_v48 }
  0x38   :  { %538 = vmatpush.bf16.msrb.mxu1 %v1033_v62 }
  0x39   :  { %619 = vmatpush.bf16.msrb.mxu2 %v1042_v11 }
  0x3b   :  { %457 = vmatpush.bf16.msrb.mxu0 %v1024_v49 }
  0x3c   :  { %539 = vmatpush.bf16.msrb.mxu1 %v1032_v63 }
  0x3d   :  { %620 = vmatpush.bf16.msrb.mxu2 %v1041_v12 }
  0x3f   :  { %458 = vmatpush.bf16.msrb.mxu0 %v1023_v50 }
  0x40   :  { %540 = vmatpush.bf16.msrb.mxu1 %v1031_v0 }
  0x41   :  { %621 = vmatpush.bf16.msrb.mxu2 %v1040_v13 }
  0x43   :  { %459 = vmatpush.bf16.msrb.mxu0 %v1022_v51 }
  0x44   :  { %541 = vmatpush.bf16.msrb.mxu1 %v1030_v1 }
  0x45   :  { %622 = vmatpush.bf16.msrb.mxu2 %v1039_v14 }
  0x47   :  { %460 = vmatpush.bf16.msrb.mxu0 %v1021_v58 }
  0x48   :  { %542 = vmatpush.bf16.msrb.mxu1 %v1029_v8 }
  0x49   :  { %623 = vmatpush.bf16.msrb.mxu2 %v1038_v15 }
  0x4b   :  { %461 = vmatpush.bf16.msrb.mxu0 %v1020_v59 }
  0x4c   :  { %543 = vmatpush.bf16.msrb.mxu1 %v1028_v9 }
  0x4d   :  { %624 = vmatpush.bf16.msrb.mxu2 %v1037_v22 }
  0x51   :  { %625 = vmatpush.bf16.msrb.mxu2 %v1036_v23 }
  0xab   :  { %v135_v25 = vpop.f32.mrf.mxu0 }
  0xac   :  { %v136_v26 = vadd.f32 %v1058_v24, %v135_v25  ;;  %v1051_v24 = vld [vmem:[#allocation5 + $0x1f8] sm:$0xff]  ;;  %v1050_v25 = vld [vmem:[#allocation5 + $0x1f0] sm:$0xff] }
  0xad   :  { %700 = vmatpush.bf16.msrb.mxu3 %v1051_v24 }
  0xae   :  { %v139_v27 = vmax.f32 %v136_v26, 0.0  ;;  %v1049_v26 = vld [vmem:[#allocation5 + $0x1e8] sm:$0xff] }
  0xb0   :  { %v158_v28 = vpack.c.bf16 %v139_v27, %v139_v27  ;;  %v1048_v27 = vld [vmem:[#allocation5 + $0x1e0] sm:$0xff] }
  0xb1   :  { %701 = vmatpush.bf16.msrb.mxu3 %v1050_v25 }
  0xb2   :  { %216 = vmatmul.bf16.vlgmr.msra.gmra.mxu1 %v158_v28  ;;  %v1047_v28 = vld [vmem:[#allocation5 + $0x1d8] sm:$0xff] }
  0xb3   :  { %v137_v29 = vpop.f32.mrf.mxu0 }
  0xb4   :  { %v1046_v29 = vld [vmem:[#allocation5 + $0x1d0] sm:$0xff] }
  0xb5   :  { %702 = vmatpush.bf16.msrb.mxu3 %v1049_v26 }
  0xb9   :  { %703 = vmatpush.bf16.msrb.mxu3 %v1048_v27 }
  0xbd   :  { %704 = vmatpush.bf16.msrb.mxu3 %v1047_v28 }
  0xc1   :  { %705 = vmatpush.bf16.msrb.mxu3 %v1046_v29 }
  0xc5   :  { %706 = vmatpush.bf16.msrb.mxu3 %v1045_v36 }
  0xc9   :  { %707 = vmatpush.bf16.msrb.mxu3 %v1044_v37 }
 0x12f   :  { %v217_v39 = vpop.f32.mrf.mxu1 }
 0x130   :  { %v218_v40 = vadd.f32 %v1059_v38, %v217_v39  ;;  %v1064_v38 = vld [vmem:[#allocation7 + $0x6] ss:$0 sm:$0xff] }
 0x132   :  { %v221_v41 = vmax.f32 %v218_v40, 0.0 }
 0x134   :  { %v240_v42 = vpack.c.bf16 %v221_v41, %v221_v41 }
 0x136   :  { %298 = vmatmul.bf16.vlgmr.msra.gmra.mxu2 %v240_v42 }
 0x137   :  { %v219_v43 = vpop.f32.mrf.mxu1 }
 0x1b9   :  { %v299_v53 = vpop.f32.mrf.mxu2 }
 0x1ba   :  { %v300_v54 = vadd.f32 %v1060_v52, %v299_v53 }
 0x1bc   :  { %v303_v55 = vmax.f32 %v300_v54, 0.0 }
 0x1be   :  { %v322_v56 = vpack.c.bf16 %v303_v55, %v303_v55 }
 0x1c0   :  { %380 = vmatmul.bf16.vlgmr.msra.gmra.mxu3 %v322_v56 }
 0x1c1   :  { %v301_v57 = vpop.f32.mrf.mxu2 }
 0x243   :  { %v381_v3 = vpop.f32.mrf.mxu3 }
 0x244   :  { %v382_v4 = vadd.f32 %v1061_v2, %v381_v3 }
 0x246   :  { %v385_v5 = vmax.f32 %v382_v4, 0.0 }
 0x248   :  { %v404_v6 = vpack.c.bf16 %v385_v5, %v385_v5 }
 0x24a   :  { %462 = vmatmul.bf16.vlgmr.msrb.gmra.mxu0 %v404_v6 }
 0x24b   :  { %v383_v7 = vpop.f32.mrf.mxu3 }
 0x2c7   :  { %v463_v17 = vpop.f32.mrf.mxu0 }
 0x2c8   :  { %v464_v18 = vadd.f32 %v1062_v16, %v463_v17 }
 0x2ca   :  { %v467_v19 = vmax.f32 %v464_v18, 0.0 }
 0x2cc   :  { %v486_v20 = vpack.c.bf16 %v467_v19, %v467_v19 }
 0x2ce   :  { %544 = vmatmul.bf16.vlgmr.msrb.gmra.mxu1 %v486_v20 }
 0x2cf   :  { %v465_v21 = vpop.f32.mrf.mxu0 }
 0x34b   :  { %v545_v31 = vpop.f32.mrf.mxu1 }
 0x34c   :  { %v546_v32 = vadd.f32 %v1063_v30, %v545_v31 }
 0x34e   :  { %v549_v33 = vmax.f32 %v546_v32, 0.0 }
 0x350   :  { %v568_v34 = vpack.c.bf16 %v549_v33, %v549_v33 }
 0x352   :  { %626 = vmatmul.bf16.vlgmr.msrb.gmra.mxu2 %v568_v34 }
 0x353   :  { %v547_v35 = vpop.f32.mrf.mxu1 }
 0x3d5   :  { %v627_v39 = vpop.f32.mrf.mxu2 }
 0x3d6   :  { %v628_v40 = vadd.f32 %v1064_v38, %v627_v39 }
 0x3d8   :  { %v631_v41 = vmax.f32 %v628_v40, 0.0 }
 0x3da   :  { %v650_v42 = vpack.c.bf16 %v631_v41, %v631_v41 }
 0x3dc   :  { %708 = vmatmul.bf16.vlgmr.msrb.gmra.mxu3 %v650_v42 }
 0x3dd   :  { %v629_v43 = vpop.f32.mrf.mxu2 }
 0x45f   :  { %v709_v45 = vpop.f32.mrf.mxu3 }
 0x460   :  { %v710_v46 = vadd.f32 %v1065_v44, %v709_v45 }
 0x462   :  { %713 = vst [vmem:[#allocation8] sm:$0xff] %v710_v46 }
 0x463   :  { %724 = dma.vmem_to_hbm [thread:$0]  %s720_s2, 128, %s722_s30, [#allocation4]  }
 0x467   :  { %v711_v47 = vpop.f32.mrf.mxu3 }
 0x468   :  { %1166 = dma.done.wait [#allocation4], 128  }
 0x469   :  { %1167 = vsyncadd [#allocation4], 4294967168 }
 0x46a   :  { %729 = vsyncpa [#allocation3], 1 }
 0x46b   :  { %730 = vsyncpa [#allocation6], 1 }
 0x46c   :  { %731 = vsyncpa [#allocation4], 1 }

</bundles_post_ra>
